<compile_context>
chip_gen: v7x
topology: tpu7x:2x2x1
jax: 0.10.0
libtpu: 0.0.40
codegen_flags: <defaults>
</compile_context>

<pallas_src>
import functools

import jax
import jax.numpy as jnp
from jax.experimental import pallas as pl
from jax.experimental.pallas import tpu as pltpu

LANE = 128  # TPU lane width


def _round_up(n, m):
    return ((n + m - 1) // m) * m


# ----------------------------- Pallas kernel --------------------------------
def ppo_forward_kernel(n_actions, obs_ref, w1_ref, b1_ref, w2_ref, b2_ref,
                       wh_ref, bh_ref, out_ref):
    obs = obs_ref[...]                                              # (TB, OBSp)

    # shared trunk (all operands lane-dense, 128-multiples -> unmasked vregs)
    h1 = jnp.tanh(
        jnp.dot(obs, w1_ref[...], preferred_element_type=jnp.float32)
        + b1_ref[...])                                              # (TB, HIDp)
    h2 = jnp.tanh(
        jnp.dot(h1, w2_ref[...], preferred_element_type=jnp.float32)
        + b2_ref[...])                                              # (TB, HIDp)

    # fused policy+value head: one matmul, one lane-dense (TB, 128) result.
    head = (jnp.dot(h2, wh_ref[...], preferred_element_type=jnp.float32)
            + bh_ref[...])                                          # (TB, 128)

    lane = jax.lax.broadcasted_iota(jnp.int32, head.shape, dimension=1)
    is_logit = lane < n_actions          # policy lanes [0 : ACT)
    is_value = lane == n_actions         # value lane   [ACT]

    # numerically stable softmax over the policy lanes only; padded lanes -> -inf
    logits = jnp.where(is_logit, head, -jnp.inf)
    m = jnp.max(logits, axis=-1, keepdims=True)
    e = jnp.exp(logits - m)              # padded lanes contribute exp(-inf) = 0
    s = jnp.sum(e, axis=-1, keepdims=True)
    probs = e * pl.reciprocal(s, approx=True)   # EUP reciprocal, not a VPU divide

    # lane-dense output slab: [probs | value | zeros]
    out_ref[...] = jnp.where(is_logit, probs,
                             jnp.where(is_value, head, 0.0))


# ------------------------------ param packing --------------------------------
def init_params(key, obs_dim, hidden, n_actions):
    """Emulates torch.nn.Linear default init: U(-1/sqrt(fan_in), 1/sqrt(fan_in))."""
    def linear(k, fan_in, fan_out):
        kw, kb = jax.random.split(k)
        bound = 1.0 / jnp.sqrt(jnp.float32(fan_in))
        w = jax.random.uniform(kw, (fan_in, fan_out), jnp.float32, -bound, bound)
        b = jax.random.uniform(kb, (1, fan_out), jnp.float32, -bound, bound)
        return w, b

    k1, k2, k3, k4 = jax.random.split(key, 4)
    w1, b1 = linear(k1, obs_dim, hidden)
    w2, b2 = linear(k2, hidden, hidden)
    wp, bp = linear(k3, hidden, n_actions)
    wv, bv = linear(k4, hidden, 1)
    return (w1, b1, w2, b2, wp, bp, wv, bv)


def pack_params(params, n_actions):
    """Zero-pads every feature dim to 128 lanes and fuses the two heads into
    one (HIDp, 128) weight: columns [0:ACT] = policy, column ACT = value."""
    (w1, b1, w2, b2, wp, bp, wv, bv) = params
    obs_dim, hidden = w1.shape
    assert n_actions + 1 <= LANE, "fused head must fit in one 128-lane vreg row"
    obs_p = _round_up(obs_dim, LANE)
    hid_p = _round_up(hidden, LANE)

    w1p = jnp.zeros((obs_p, hid_p), jnp.float32).at[:obs_dim, :hidden].set(w1)
    b1p = jnp.zeros((1, hid_p), jnp.float32).at[:, :hidden].set(b1)
    w2p = jnp.zeros((hid_p, hid_p), jnp.float32).at[:hidden, :hidden].set(w2)
    b2p = jnp.zeros((1, hid_p), jnp.float32).at[:, :hidden].set(b2)

    wh = jnp.zeros((hid_p, LANE), jnp.float32)
    wh = wh.at[:hidden, :n_actions].set(wp)
    wh = wh.at[:hidden, n_actions:n_actions + 1].set(wv)
    bh = jnp.zeros((1, LANE), jnp.float32)
    bh = bh.at[:, :n_actions].set(bp)
    bh = bh.at[:, n_actions:n_actions + 1].set(bv)
    return (w1p, b1p, w2p, b2p, wh, bh)


# ------------------------------ host wrapper ---------------------------------
def ppo_model_forward(obs, packed, *, n_actions, block_b=128):
    """Full actor-critic forward (returns (policy_probs, value))."""
    (w1, b1, w2, b2, wh, bh) = packed
    B, obs_dim = obs.shape
    obs_p, hid_p = w1.shape

    # batch padded to a multiple of the batch tile; features zero-padded to 128.
    b_pad = _round_up(max(B, 1), block_b)
    obs_pad = jnp.zeros((b_pad, obs_p), jnp.float32).at[:B, :obs_dim].set(obs)

    const2 = lambda i: (0, 0)
    out = pl.pallas_call(
        functools.partial(ppo_forward_kernel, n_actions),
        out_shape=jax.ShapeDtypeStruct((b_pad, LANE), jnp.float32),
        grid=(b_pad // block_b,),
        in_specs=[
            pl.BlockSpec((block_b, obs_p), lambda i: (i, 0)),   # obs tile
            pl.BlockSpec((obs_p, hid_p), const2),               # w1 (resident)
            pl.BlockSpec((1, hid_p), const2),                   # b1
            pl.BlockSpec((hid_p, hid_p), const2),               # w2
            pl.BlockSpec((1, hid_p), const2),                   # b2
            pl.BlockSpec((hid_p, LANE), const2),                # fused head W
            pl.BlockSpec((1, LANE), const2),                    # fused head b
        ],
        out_specs=pl.BlockSpec((block_b, LANE), lambda i: (i, 0)),
        compiler_params=pltpu.CompilerParams(
            dimension_semantics=("parallel",)),   # shards across 2 TCs on v7x
    )(obs_pad, w1, b1, w2, b2, wh, bh)

    probs = out[:B, :n_actions]
    value = out[:B, n_actions:n_actions + 1]
    return probs, value


def ppo_agent_forward(obs, packed, *, n_actions, block_b=128):
    """PPOAgent.forward semantics: value only."""
    _, value = ppo_model_forward(obs, packed, n_actions=n_actions,
                                 block_b=block_b)
    return value


# ------------------------------ pure-JAX ref ---------------------------------
def ppo_forward_ref(obs, params):
    (w1, b1, w2, b2, wp, bp, wv, bv) = params
    h1 = jnp.tanh(obs @ w1 + b1)
    h2 = jnp.tanh(h1 @ w2 + b2)
    probs = jax.nn.softmax(h2 @ wp + bp, axis=-1)
    value = h2 @ wv + bv
    return probs, value


if __name__ == "__main__":
    B, OBS_DIM, HIDDEN, N_ACTIONS = 256, 32, 64, 8

    key = jax.random.PRNGKey(0)
    k_obs, k_par = jax.random.split(key)
    obs = jax.random.normal(k_obs, (B, OBS_DIM), jnp.float32)
    params = init_params(k_par, OBS_DIM, HIDDEN, N_ACTIONS)
    packed = pack_params(params, N_ACTIONS)

    probs, value = ppo_model_forward(obs, packed, n_actions=N_ACTIONS)
    jax.block_until_ready((probs, value))

    # correctness check against a pure-JAX reference
    probs_ref, value_ref = ppo_forward_ref(obs, params)
    # probs use the approx EUP reciprocal -> slightly looser tolerance
    assert jnp.allclose(probs, probs_ref, atol=5e-3, rtol=5e-3)
    assert jnp.allclose(jnp.sum(probs, axis=-1), 1.0, atol=5e-3)
    assert jnp.allclose(value, value_ref, atol=1e-4, rtol=1e-4)
    assert probs.shape == (B, N_ACTIONS) and value.shape == (B, 1)

    # PPOAgent.forward path (value only)
    v_only = ppo_agent_forward(obs, packed, n_actions=N_ACTIONS)
    jax.block_until_ready(v_only)
    assert jnp.allclose(v_only, value_ref, atol=1e-4, rtol=1e-4)

    print("KERNEL_OK")
</pallas_src>

<mosaic_0001>
module attributes {stable_mosaic.version = 11 : i64} {
  func.func @ppo_forward_kernel(%arg0: i32, %arg1: memref<128x128xf32, #tpu.memory_space<vmem>>, %arg2: memref<128x128xf32, #tpu.memory_space<vmem>>, %arg3: memref<1x128xf32, #tpu.memory_space<vmem>>, %arg4: memref<128x128xf32, #tpu.memory_space<vmem>>, %arg5: memref<1x128xf32, #tpu.memory_space<vmem>>, %arg6: memref<128x128xf32, #tpu.memory_space<vmem>>, %arg7: memref<1x128xf32, #tpu.memory_space<vmem>>, %arg8: memref<128x128xf32, #tpu.memory_space<vmem>>) attributes {dimension_semantics = [#tpu.dimension_semantics<parallel>], iteration_bounds = array<i64: 2>, scalar_prefetch = 0 : i64, scratch_operands = 0 : i64, tpu.core_type = #tpu.core_type<tc>, window_params = [{transform_indices = @transform_0, window_bounds = array<i64: 128, 128>}, {pipeline_mode = #tpu.pipeline_mode<synchronous>, transform_indices = @transform_1, window_bounds = array<i64: 128, 128>}, {pipeline_mode = #tpu.pipeline_mode<synchronous>, transform_indices = @transform_2, window_bounds = array<i64: 1, 128>}, {pipeline_mode = #tpu.pipeline_mode<synchronous>, transform_indices = @transform_3, window_bounds = array<i64: 128, 128>}, {pipeline_mode = #tpu.pipeline_mode<synchronous>, transform_indices = @transform_4, window_bounds = array<i64: 1, 128>}, {pipeline_mode = #tpu.pipeline_mode<synchronous>, transform_indices = @transform_5, window_bounds = array<i64: 128, 128>}, {pipeline_mode = #tpu.pipeline_mode<synchronous>, transform_indices = @transform_6, window_bounds = array<i64: 1, 128>}, {transform_indices = @transform_7, window_bounds = array<i64: 128, 128>}]} {
    %c0 = arith.constant 0 : index
    %c0_0 = arith.constant 0 : index
    %0 = vector.load %arg1[%c0, %c0_0] : memref<128x128xf32, #tpu.memory_space<vmem>>, vector<128x128xf32>
    %c0_1 = arith.constant 0 : index
    %c0_2 = arith.constant 0 : index
    %1 = vector.load %arg2[%c0_1, %c0_2] : memref<128x128xf32, #tpu.memory_space<vmem>>, vector<128x128xf32>
    %cst = arith.constant dense<0.000000e+00> : vector<128x128xf32>
    %2 = tpu.matmul %0, %1, %cst {dimension_numbers = #tpu.dot_dimension_numbers<[1], [0], [0], [1], [0, 0, 1, 1], [], []>} : vector<128x128xf32>, vector<128x128xf32>, vector<128x128xf32> -> vector<128x128xf32>
    %c0_3 = arith.constant 0 : index
    %c0_4 = arith.constant 0 : index
    %3 = vector.load %arg3[%c0_3, %c0_4] : memref<1x128xf32, #tpu.memory_space<vmem>>, vector<1x128xf32>
    %4 = vector.broadcast %3 : vector<1x128xf32> to vector<128x128xf32>
    %5 = arith.addf %2, %4 : vector<128x128xf32>
    %6 = math.tanh %5 : vector<128x128xf32>
    %c0_5 = arith.constant 0 : index
    %c0_6 = arith.constant 0 : index
    %7 = vector.load %arg4[%c0_5, %c0_6] : memref<128x128xf32, #tpu.memory_space<vmem>>, vector<128x128xf32>
    %cst_7 = arith.constant dense<0.000000e+00> : vector<128x128xf32>
    %8 = tpu.matmul %6, %7, %cst_7 {dimension_numbers = #tpu.dot_dimension_numbers<[1], [0], [0], [1], [0, 0, 1, 1], [], []>} : vector<128x128xf32>, vector<128x128xf32>, vector<128x128xf32> -> vector<128x128xf32>
    %c0_8 = arith.constant 0 : index
    %c0_9 = arith.constant 0 : index
    %9 = vector.load %arg5[%c0_8, %c0_9] : memref<1x128xf32, #tpu.memory_space<vmem>>, vector<1x128xf32>
    %10 = vector.broadcast %9 : vector<1x128xf32> to vector<128x128xf32>
    %11 = arith.addf %8, %10 : vector<128x128xf32>
    %12 = math.tanh %11 : vector<128x128xf32>
    %c0_10 = arith.constant 0 : index
    %c0_11 = arith.constant 0 : index
    %13 = vector.load %arg6[%c0_10, %c0_11] : memref<128x128xf32, #tpu.memory_space<vmem>>, vector<128x128xf32>
    %cst_12 = arith.constant dense<0.000000e+00> : vector<128x128xf32>
    %14 = tpu.matmul %12, %13, %cst_12 {dimension_numbers = #tpu.dot_dimension_numbers<[1], [0], [0], [1], [0, 0, 1, 1], [], []>} : vector<128x128xf32>, vector<128x128xf32>, vector<128x128xf32> -> vector<128x128xf32>
    %c0_13 = arith.constant 0 : index
    %c0_14 = arith.constant 0 : index
    %15 = vector.load %arg7[%c0_13, %c0_14] : memref<1x128xf32, #tpu.memory_space<vmem>>, vector<1x128xf32>
    %16 = vector.broadcast %15 : vector<1x128xf32> to vector<128x128xf32>
    %17 = arith.addf %14, %16 : vector<128x128xf32>
    %18 = tpu.iota {dimensions = array<i32: 1>} : vector<128x128xi32>
    %c8_i32 = arith.constant 8 : i32
    %19 = vector.broadcast %c8_i32 : i32 to vector<128x128xi32>
    %20 = arith.cmpi slt, %18, %19 : vector<128x128xi32>
    %c8_i32_15 = arith.constant 8 : i32
    %21 = vector.broadcast %c8_i32_15 : i32 to vector<128x128xi32>
    %22 = arith.cmpi eq, %18, %21 : vector<128x128xi32>
    %cst_16 = arith.constant 0xFF800000 : f32
    %23 = vector.broadcast %cst_16 : f32 to vector<128x128xf32>
    %24 = arith.select %20, %17, %23 : vector<128x128xi1>, vector<128x128xf32>
    %cst_17 = arith.constant dense<0xFF800000> : vector<128xf32>
    %25 = vector.multi_reduction <maximumf>, %24, %cst_17 [1] : vector<128x128xf32> to vector<128xf32>
    %26 = vector.shape_cast %25 : vector<128xf32> to vector<128x1xf32>
    %27 = vector.broadcast %26 : vector<128x1xf32> to vector<128x128xf32>
    %28 = arith.subf %24, %27 : vector<128x128xf32>
    %29 = math.exp %28 : vector<128x128xf32>
    %cst_18 = arith.constant dense<0.000000e+00> : vector<128xf32>
    %30 = vector.multi_reduction <add>, %29, %cst_18 [1] : vector<128x128xf32> to vector<128xf32>
    %31 = vector.shape_cast %30 : vector<128xf32> to vector<128x1xf32>
    %32 = tpu.reciprocal %31 {approx = true} : vector<128x1xf32> -> vector<128x1xf32>
    %33 = vector.broadcast %32 : vector<128x1xf32> to vector<128x128xf32>
    %34 = arith.mulf %29, %33 : vector<128x128xf32>
    %cst_19 = arith.constant 0.000000e+00 : f32
    %35 = vector.broadcast %cst_19 : f32 to vector<128x128xf32>
    %36 = arith.select %22, %17, %35 : vector<128x128xi1>, vector<128x128xf32>
    %37 = arith.select %20, %34, %36 : vector<128x128xi1>, vector<128x128xf32>
    %c0_20 = arith.constant 0 : index
    %c0_21 = arith.constant 0 : index
    %38 = vector.load %arg8[%c0_20, %c0_21] : memref<128x128xf32, #tpu.memory_space<vmem>>, vector<128x128xf32>
    tpu.vector_store %arg8[%c0_20, %c0_21], %37 {strides = array<i32>} : memref<128x128xf32, #tpu.memory_space<vmem>>, vector<128x128xf32>,
    return
  }
  func.func @transform_0(%arg0: i32) -> (i32, i32) {
    %c0_i32 = arith.constant 0 : i32
    %c0_i32_0 = arith.constant 0 : i32
    return %arg0, %c0_i32 : i32, i32
  }
  func.func @transform_1(%arg0: i32) -> (i32, i32) {
    %c0_i32 = arith.constant 0 : i32
    %c0_i32_0 = arith.constant 0 : i32
    %c0_i32_1 = arith.constant 0 : i32
    return %c0_i32, %c0_i32_0 : i32, i32
  }
  func.func @transform_2(%arg0: i32) -> (i32, i32) {
    %c0_i32 = arith.constant 0 : i32
    %c0_i32_0 = arith.constant 0 : i32
    %c0_i32_1 = arith.constant 0 : i32
    return %c0_i32, %c0_i32_0 : i32, i32
  }
  func.func @transform_3(%arg0: i32) -> (i32, i32) {
    %c0_i32 = arith.constant 0 : i32
    %c0_i32_0 = arith.constant 0 : i32
    %c0_i32_1 = arith.constant 0 : i32
    return %c0_i32, %c0_i32_0 : i32, i32
  }
  func.func @transform_4(%arg0: i32) -> (i32, i32) {
    %c0_i32 = arith.constant 0 : i32
    %c0_i32_0 = arith.constant 0 : i32
    %c0_i32_1 = arith.constant 0 : i32
    return %c0_i32, %c0_i32_0 : i32, i32
  }
  func.func @transform_5(%arg0: i32) -> (i32, i32) {
    %c0_i32 = arith.constant 0 : i32
    %c0_i32_0 = arith.constant 0 : i32
    %c0_i32_1 = arith.constant 0 : i32
    return %c0_i32, %c0_i32_0 : i32, i32
  }
  func.func @transform_6(%arg0: i32) -> (i32, i32) {
    %c0_i32 = arith.constant 0 : i32
    %c0_i32_0 = arith.constant 0 : i32
    %c0_i32_1 = arith.constant 0 : i32
    return %c0_i32, %c0_i32_0 : i32, i32
  }
  func.func @transform_7(%arg0: i32) -> (i32, i32) {
    %c0_i32 = arith.constant 0 : i32
    %c0_i32_0 = arith.constant 0 : i32
    return %arg0, %c0_i32 : i32, i32
  }
}

</mosaic_0001>

<bundles_post_ra>
// kernel: tpu_custom_call.1
= control target key start
LH: loop header
LB: loop body
LE: loop exit
PB: predicated region body
PF: predicated region fallthrough
CT: control target
= control target key end

     0   :  { %12 = vsyncpa [#allocation3], 0  ;;  %s2747_s0 = inlined_call_operand.hbm [shape: f32[256,128], index: 0, kind: input, shape index: {}]   ;;  %s2748_s1 = inlined_call_operand.hbm [shape: f32[128,128], index: 1, kind: input, shape index: {}]   ;;  %s2749_s2 = inlined_call_operand.vmem [shape: f32[1,128], index: 2, kind: input, shape index: {}]   ;;  %s2750_s3 = inlined_call_operand.hbm [shape: f32[128,128], index: 3, kind: input, shape index: {}]   ;;  %s2751_s4 = inlined_call_operand.vmem [shape: f32[1,128], index: 4, kind: input, shape index: {}]   ;;  %s2752_s5 = inlined_call_operand.hbm [shape: f32[128,128], index: 5, kind: input, shape index: {}]   ;;  %s2753_s6 = inlined_call_operand.vmem [shape: f32[1,128], index: 6, kind: input, shape index: {}]   ;;  %s2754_s7 = inlined_call_operand.hbm [shape: f32[256,128], index: 7, kind: output, shape index: {}]  }
   0x1   :  { %14 = vsyncpa [#allocation3 + $0x1], 0 }
   0x2   :  { %15 = vsyncpa [#allocation6], 0 }
   0x3   :  { %16 = vsyncpa [#allocation9], 0 }
   0x4   :  { %17 = vsyncpa [#allocation4], 0 }
   0x5   :  { %19 = vsyncpa [#allocation4 + $0x1], 0  ;;  %s2072_s24 = smov 0   ;;  %s2074_s25 = smov 0  }
   0x6   :  { %s2076_s26 = smov 0   ;;  %s2078_s27 = smov 0  }
   0x7 LB: > { %s2093_s28 = sadd.s32 4294967295, %s2021_s27   ;;  %s1223_s29 = sadd.s32 4294967294, %s2021_s27   ;;  %s2021_s27 = sphi %s2078_s27, %s2780_s27   ;;  %s2017_s26 = sphi %s2076_s26, %s2779_s26   ;;  %s2013_s25 = sphi %s2074_s25, %s2778_s25   ;;  %s2009_s24 = sphi %s2072_s24, %s2777_s24  }
   0x8   : > { %p45_p0 = scmp.ne.s32.totalorder %s2013_s25, %s2009_s24  ;;  %p2755_p1 = scmp.eq.s32.totalorder %s2093_s28, 0 }
   0x9   : > { %p201_p3 = scmp.eq.s32.totalorder %s1223_s29, 1  ;;  %p1224_p5 = scmp.ge.s32.totalorder %s2021_s27, 1 }
   0xa   : > { %p2102_p4 = por %p2755_p1, %p45_p0  ;;  %p208_p7 = scmp.lt.s32.totalorder %s2021_s27, 3 }
   0xb   : > { %p2107_p6 = por %p201_p3, %p45_p0  ;;  %s2023_s10 = smov [#allocation5]  }
   0xc   : > { %s2759_s30 = scalar_select %p2102_p4, 1, 0 }
   0xd   : > { %s2760_s8 = scalar_select %p2107_p6, 1, 0 }
   0xe   : > { %p2112_p8 = pnand %p1224_p5, %p208_p7  ;;  %s220_s11 = sshll.u32 %s2023_s10, 4  ;;  %s2116_s11 = int_to_ptr.vmem [resolvable:$true] %s220_s11 }
   0xf   : > { %2761 = sst [smem:[#allocation15_spill]] %s2760_s8  ;;  %s2024_s13 = smov [#allocation7]  }
  0x10   : > { %s2762_s9 = scalar_select %p2112_p8, 1, 0 }
  0x11   : > { %p1640_p9 = pneg %p2112_p8  ;;  %s236_s14 = sshll.u32 %s2024_s13, 4  ;;  %s2127_s14 = int_to_ptr.vmem [resolvable:$true] %s236_s14 }
  0x12   : > { %s2025_s15 = smov [#allocation8]   ;;  %s1833_s19 = scalar_lea.hbm %s2748_s1, 2048 }
  0x13   : > { %p2123_p11 = pnand %p1640_p9, %p2755_p1  ;;  %s2129_s16 = sshll.u32 %s2025_s15, 4  ;;  %s253_s16 = int_to_ptr.vmem [resolvable:$true] %s2129_s16 }
  0x14   : > { %p1834_p12 = scmp.ne.s32.totalorder %s2748_s1, %s1833_s19  ;;  %p1840_p5 = scmp.lt.u32.totalorder %s1833_s19, %s2748_s1 }
  0x15   : > { %p2139_p13 = pneg %p2123_p11 }
  0x17   : > { %p1836_p0 = pnand %p2139_p13, %p1834_p12 }
  0x19   : > { %p1837_p3 = pneg %p1836_p0 }
  0x1b   : > { %p1842_p7 = pnand %p1840_p5, %p1837_p3 }
  0x1d   : > { %1845 = shalt.err (!%p1842_p7)
}
  0x1e   : > { %s1846_s10 = scalar_lea.vmem %s2116_s11, 2048  ;;  %p1854_p2 = scmp.lt.s32.totalorder %s2116_s11, %s2116_s11 }
  0x1f   : > { %p1847_p9 = scmp.ne.s32.totalorder %s2116_s11, %s1846_s10  ;;  %p1855_p6 = scmp.lt.s32.totalorder %s1846_s10, %s1846_s10 }
  0x21   : > { %p1849_p10 = pnand %p1847_p9, %p2139_p13  ;;  %p1856_p12 = por %p1855_p6, %p1854_p2 }
  0x23   : > { %p1850_p1 = pneg %p1849_p10 }
  0x25   : > { %p1857_p0 = pnand %p1856_p12, %p1850_p1 }
  0x27   : > { %1860 = shalt.err (!%p1857_p0)
}
  0x28   : > { %s2026_s13 = smov 128   ;;  %s2027_s15 = smov 8  }
  0x29   : > { %1643 = dma.hbm_to_vmem [thread:$0]  (!%p2123_p11), %s2748_s1, 2048, %s2116_s11, [#allocation6], %s2026_s13, %s2026_s13, %s2027_s15  }
  0x2a   : > { %s1861_s21 = scalar_lea.hbm %s2750_s3, 2048 }
  0x2b   : > { %p1862_p1 = scmp.ne.s32.totalorder %s2750_s3, %s1861_s21  ;;  %p1868_p10 = scmp.lt.u32.totalorder %s1861_s21, %s2750_s3 }
  0x2d   : > { %p1864_p2 = pnand %p1862_p1, %p2139_p13 }
  0x2f   : > { %p1865_p6 = pneg %p1864_p2 }
  0x31   : > { %p1870_p3 = pnand %p1868_p10, %p1865_p6 }
  0x33   : > { %1873 = shalt.err (!%p1870_p3)
}
  0x34   : > { %s1874_s11 = scalar_lea.vmem %s2127_s14, 2048  ;;  %p1882_p12 = scmp.lt.s32.totalorder %s2127_s14, %s2127_s14 }
  0x35   : > { %p1875_p5 = scmp.ne.s32.totalorder %s2127_s14, %s1874_s11  ;;  %p1883_p0 = scmp.lt.s32.totalorder %s1874_s11, %s1874_s11 }
  0x37   : > { %p1877_p7 = pnand %p1875_p5, %p2139_p13  ;;  %p1884_p1 = por %p1883_p0, %p1882_p12 }
  0x39   : > { %p1878_p9 = pneg %p1877_p7 }
  0x3b   : > { %p1885_p2 = pnand %p1884_p1, %p1878_p9 }
  0x3d   : > { %1888 = shalt.err (!%p1885_p2)
}
  0x3e   : > { %1646 = dma.hbm_to_vmem [thread:$0]  (!%p2123_p11), %s2750_s3, 2048, %s2127_s14, [#allocation6], %s2026_s13, %s2026_s13, %s2027_s15  }
  0x3f   : > { %s1889_s20 = scalar_lea.hbm %s2752_s5, 2048 }
  0x40   : > { %p1890_p6 = scmp.ne.s32.totalorder %s2752_s5, %s1889_s20  ;;  %p1896_p5 = scmp.lt.u32.totalorder %s1889_s20, %s2752_s5 }
  0x42   : > { %p1892_p10 = pnand %p1890_p6, %p2139_p13 }
  0x44   : > { %p1893_p3 = pneg %p1892_p10 }
  0x46   : > { %p1898_p7 = pnand %p1896_p5, %p1893_p3 }
  0x48   : > { %1901 = shalt.err (!%p1898_p7)
}
  0x49   : > { %s1902_s11 = scalar_lea.vmem %s253_s16, 2048  ;;  %p1910_p1 = scmp.lt.s32.totalorder %s253_s16, %s253_s16 }
  0x4a   : > { %p1903_p9 = scmp.ne.s32.totalorder %s253_s16, %s1902_s11  ;;  %p1911_p2 = scmp.lt.s32.totalorder %s1902_s11, %s1902_s11 }
  0x4c   : > { %p1905_p12 = pnand %p1903_p9, %p2139_p13  ;;  %p1912_p4 = por %p1911_p2, %p1910_p1 }
  0x4e   : > { %p1906_p0 = pneg %p1905_p12 }
  0x50   : > { %p1913_p8 = pnand %p1912_p4, %p1906_p0 }
  0x52   : > { %1916 = shalt.err (!%p1913_p8)
}
  0x53   : > { %1649 = dma.hbm_to_vmem [thread:$0]  (!%p2123_p11), %s2752_s5, 2048, %s253_s16, [#allocation9], %s2026_s13, %s2026_s13, %s2027_s15  }
  0x54   : > { %s2212_s22 = sadd.s32 1, %s2021_s27   ;;  %s32_s17 = sadd.s32 1, %s2017_s26 }
  0x55   : > { %s29_s12 = ssub.s32 %s2021_s27, %s2212_s22  ;;  %p39_p8 = scmp.ne.s32.totalorder %s2017_s26, %s2013_s25 }
  0x56   : > { %p30_p4 = scmp.eq.s32.totalorder %s29_s12, 0  ;;  %p40_p13 = scmp.eq.s32.totalorder %s2021_s27, 0 }
  0x57   : > { %p1661_p6 = scmp.lt.s32.totalorder %s2021_s27, 2  ;;  %p2765_p3 = scmp.eq.s32.totalorder %s2093_s28, 1 }
  0x58   : > { %s2222_s18 = scalar_select %p30_p4, %s2017_s26, %s32_s17  }
  0x59   : > { %p41_p10 = por %p40_p13, %p39_p8  ;;  %p2226_p5 = por %p2765_p3, %p39_p8 }
  0x5a   : > { %s269_s20 = sand.u32 1, %s2017_s26   ;;  %s1246_s21 = sshll.u32 %s2021_s27, 11 }
  0x5b   : > { %s1229_s16 = sshll.u32 %s269_s20, 7  ;;  %s2235_s10 = scalar_lea.hbm %s2747_s0, %s1246_s21 }
  0x5c   : > { %s273_s11 = scalar_lea.vmem [#allocation2], %s1229_s16  ;;  %p2237_p11 = pnand %p1661_p6, %p41_p10 }
  0x5d   : > { %s280_s14 = sshll.u32 %s273_s11, 4  ;;  %s2243_s12 = scalar_lea.sflag [#allocation3], %s269_s20  ;;  %s2241_s14 = int_to_ptr.vmem [resolvable:$true] %s280_s14 }
  0x5e   : > { %s1917_s17 = scalar_lea.hbm %s2235_s10, 2048  ;;  %p1919_p9 = pneg %p2237_p11 }
  0x5f   : > { %p1918_p7 = scmp.ne.s32.totalorder %s2235_s10, %s1917_s17  ;;  %s1922_s23 = scalar_lea.hbm %s2747_s0, 4096 }
  0x60   : > { %p1923_p1 = scmp.lt.u32.totalorder %s2235_s10, %s2747_s0  ;;  %p1924_p2 = scmp.lt.u32.totalorder %s1922_s23, %s1917_s17 }
  0x61   : > { %p1920_p12 = pnand %p1919_p9, %p1918_p7  ;;  %p1926_p8 = scmp.lt.u32.totalorder %s1917_s17, %s2235_s10 }
  0x62   : > { %p1925_p4 = por %p1924_p2, %p1923_p1 }
  0x63   : > { %p1921_p0 = pneg %p1920_p12 }
  0x64   : > { %p1927_p13 = por %p1926_p8, %p1925_p4 }
  0x66   : > { %p1928_p6 = pnand %p1927_p13, %p1921_p0 }
  0x68   : > { %1931 = shalt.err (!%p1928_p6)
}
  0x69   : > { %s1932_s20 = scalar_lea.vmem %s2241_s14, 2048  ;;  %s2028_s21 = smov [#allocation2]  }
  0x6a   : > { %p1933_p10 = scmp.ne.s32.totalorder %s2241_s14, %s1932_s20  ;;  %s1937_s16 = sshll.u32 %s2028_s21, 4  ;;  %s1938_s16 = int_to_ptr.vmem [resolvable:$false] %s1937_s16 }
  0x6b   : > { %s1939_s29 = scalar_lea.vmem %s1938_s16, 4096  ;;  %p1940_p12 = scmp.lt.s32.totalorder %s2241_s14, %s1938_s16 }
  0x6c   : > { %p1935_p3 = pnand %p1933_p10, %p1919_p9  ;;  %p1941_p1 = scmp.lt.s32.totalorder %s1939_s29, %s1932_s20 }
  0x6e   : > { %p1936_p7 = pneg %p1935_p3  ;;  %p1942_p2 = por %p1941_p1, %p1940_p12 }
  0x70   : > { %p1943_p4 = pnand %p1942_p2, %p1936_p7 }
  0x72   : > { %1946 = shalt.err (!%p1943_p4)
}
  0x73   : > { %1653 = dma.hbm_to_vmem [thread:$0]  (!%p2237_p11), %s2235_s10, 2048, %s2241_s14, %s2243_s12, %s2026_s13, %s2026_s13, %s2027_s15  }
  0x74   : > { %p2768_p9 = scmp.ne.s32.totalorder %s2762_s9, 0 }
  0x75   : > { %s2277_s17 = sand.u32 (!%p2768_p9), 1, %s2013_s25   ;;  %p2769_p0 = scmp.ne.s32.totalorder (!%p2768_p9), %s2759_s30, 0 }
  0x76   : > { %292 = sbr.rel (%p2768_p9) target bundleno = 1198 (0x4ae), region = 48  ;;  %s1233_s23 = sshll.u32 (!%p2768_p9), %s2277_s17, 7 }
  0x77   : > { %s295_s11 = scalar_lea.sflag (!%p2768_p9), [#allocation3], %s2277_s17  ;;  %s2283_s8 = scalar_lea.vmem (!%p2768_p9), [#allocation2], %s1233_s23 }
  0x7d   : > { %1992 = dma.done.wait (%p2769_p0), %s295_s11, 2048  }
  0x7e   : > { %1994 = vsyncadd (%p2769_p0), %s295_s11, 4294965248  ;;  %p2770_p11 = scmp.eq.s32.totalorder %s2093_s28, 0 }
  0x80   : > { %1996 = dma.done.wait (%p2770_p11), [#allocation6], 4096   ;;  %p2771_p8 = pmov %p2770_p11 }
  0x82   : > { %1998 = vsyncadd (%p2771_p8), [#allocation6], 4294963200  ;;  %p2772_p13 = pmov %p2771_p8 }
  0x83   : > { %p2773_p6 = pmov %p2771_p8 }
  0x84   : > { %2000 = dma.done.wait (%p2772_p13), [#allocation9], 2048  }
  0x85   : > { %2002 = vsyncadd (%p2773_p6), [#allocation9], 4294965248  ;;  %v359_v0 = vld [vmem:[#allocation5] sm:$0xff]  ;;  %v360_v1 = vld [vmem:[#allocation5 + $0x8] sm:$0xff]  ;;  %s2618_s12 = scalar_lea.vmem [#allocation10], %s1233_s23  ;;  %s1247_s20 = sshll.u32 %s2093_s28, 11 }
  0x86   : > { %v361_v2 = vld [vmem:[#allocation5 + $0x10] sm:$0xff]  ;;  %v1512_v3 = vpack.c.bf16 %v360_v1, %v359_v0  ;;  %v362_v4 = vld [vmem:[#allocation5 + $0x18] sm:$0xff]  ;;  %v363_v6 = vld [vmem:[#allocation5 + $0x20] sm:$0xff]  ;;  %s1121_s21 = sshll.u32 %s2618_s12, 4  ;;  %s2693_s23 = scalar_lea.hbm %s2754_s7, %s1247_s20  ;;  %s2695_s21 = int_to_ptr.vmem [resolvable:$true] %s1121_s21 }
  0x87   : > { %v1516_v5 = vpack.c.bf16 %v362_v4, %v361_v2  ;;  %v364_v7 = vld [vmem:[#allocation5 + $0x28] sm:$0xff]  ;;  %v343_v9 = vld [vmem:[%s2283_s8] sm:$0xff]  ;;  %v365_v10 = vld [vmem:[#allocation5 + $0x30] sm:$0xff]  ;;  %s1108_s28 = scalar_lea.sflag [#allocation4], %s2277_s17  ;;  %s1947_s11 = scalar_lea.vmem %s2695_s21, 2048 }
  0x88   : > { %1513 = vmatprep.subr.bf16.mxu0 %v1512_v3  ;;  %v1520_v8 = vpack.c.bf16 %v364_v7, %v363_v6  ;;  %v366_v11 = vld [vmem:[#allocation5 + $0x38] sm:$0xff]  ;;  %1376 = vmatprep.mubr.f32.mxu0 %v343_v9  ;;  %v367_v13 = vld [vmem:[#allocation5 + $0x40] sm:$0xff]  ;;  %v368_v14 = vld [vmem:[#allocation5 + $0x48] sm:$0xff]  ;;  %p1948_p10 = scmp.ne.s32.totalorder %s2695_s21, %s1947_s11 }
  0x89   : > { %1515 = vmatpush3.bf16.msra.mxu0 %v1512_v3  ;;  %v1524_v12 = vpack.c.bf16 %v366_v11, %v365_v10  ;;  %v543_v15 = vld [vmem:[#allocation7] sm:$0xff]  ;;  %v544_v16 = vld [vmem:[#allocation7 + $0x8] sm:$0xff]  ;;  %v545_v17 = vld [vmem:[#allocation7 + $0x10] sm:$0xff]  ;;  %v1528_v21 = vpack.c.bf16 %v368_v14, %v367_v13 }
  0x8a   : > { %1517 = vmatprep.subr.bf16.mxu0 %v1516_v5  ;;  %v546_v18 = vld [vmem:[#allocation7 + $0x18] sm:$0xff]  ;;  %v1544_v19 = vpack.c.bf16 %v544_v16, %v543_v15  ;;  %v547_v22 = vld [vmem:[#allocation7 + $0x20] sm:$0xff]  ;;  %v548_v23 = vld [vmem:[#allocation7 + $0x28] sm:$0xff]  ;;  %p1949_p3 = pnand %p1948_p10, %p2226_p5 }
  0x8b   : > { %v1548_v20 = vpack.c.bf16 %v546_v18, %v545_v17  ;;  %v369_v24 = vld [vmem:[#allocation5 + $0x50] sm:$0xff]  ;;  %v370_v25 = vld [vmem:[#allocation5 + $0x58] sm:$0xff]  ;;  %v1552_v26 = vpack.c.bf16 %v548_v23, %v547_v22  ;;  %v371_v30 = vld [vmem:[#allocation5 + $0x60] sm:$0xff] }
  0x8c   : > { %1545 = vmatprep.subr.bf16.mxu1 %v1544_v19  ;;  %v1532_v27 = vpack.c.bf16 %v370_v25, %v369_v24  ;;  %v549_v28 = vld [vmem:[#allocation7 + $0x30] sm:$0xff]  ;;  %v550_v29 = vld [vmem:[#allocation7 + $0x38] sm:$0xff]  ;;  %v372_v31 = vld [vmem:[#allocation5 + $0x68] sm:$0xff]  ;;  %p1950_p7 = pneg %p1949_p3 }
  0x8d   : > { %1519 = vmatpush3.bf16.msra.mxu0 %v1516_v5  ;;  %1547 = vmatpush3.bf16.msra.mxu1 %v1544_v19  ;;  %v1556_v32 = vpack.c.bf16 %v550_v29, %v549_v28  ;;  %v1536_v33 = vpack.c.bf16 %v372_v31, %v371_v30  ;;  %v373_v34 = vld [vmem:[#allocation5 + $0x70] sm:$0xff]  ;;  %v374_v35 = vld [vmem:[#allocation5 + $0x78] sm:$0xff]  ;;  %v344_v37 = vld [vmem:[%s2283_s8 + $0x8] sm:$0xff] }
  0x8e   : > { %1521 = vmatprep.subr.bf16.mxu0 %v1520_v8  ;;  %1549 = vmatprep.subr.bf16.mxu1 %v1548_v20  ;;  %v1540_v36 = vpack.c.bf16 %v374_v35, %v373_v34  ;;  %v345_v38 = vld [vmem:[%s2283_s8 + $0x10] sm:$0xff]  ;;  %v346_v39 = vld [vmem:[%s2283_s8 + $0x18] sm:$0xff]  ;;  %v347_v40 = vld [vmem:[%s2283_s8 + $0x20] sm:$0xff] }
  0x8f   : > { %v348_v41 = vld [vmem:[%s2283_s8 + $0x28] sm:$0xff]  ;;  %v349_v42 = vld [vmem:[%s2283_s8 + $0x30] sm:$0xff]  ;;  %v350_v43 = vld [vmem:[%s2283_s8 + $0x38] sm:$0xff] }
  0x90   : > { %v351_v44 = vld [vmem:[%s2283_s8 + $0x40] sm:$0xff]  ;;  %v352_v45 = vld [vmem:[%s2283_s8 + $0x48] sm:$0xff]  ;;  %v353_v46 = vld [vmem:[%s2283_s8 + $0x50] sm:$0xff] }
  0x91   : > { %1523 = vmatpush3.bf16.msra.mxu0 %v1520_v8  ;;  %1551 = vmatpush3.bf16.msra.mxu1 %v1548_v20  ;;  %v354_v47 = vld [vmem:[%s2283_s8 + $0x58] sm:$0xff]  ;;  %v355_v48 = vld [vmem:[%s2283_s8 + $0x60] sm:$0xff]  ;;  %v356_v49 = vld [vmem:[%s2283_s8 + $0x68] sm:$0xff] }
  0x92   : > { %1525 = vmatprep.subr.bf16.mxu0 %v1524_v12  ;;  %1553 = vmatprep.subr.bf16.mxu1 %v1552_v26  ;;  %v357_v50 = vld [vmem:[%s2283_s8 + $0x70] sm:$0xff]  ;;  %v358_v51 = vld [vmem:[%s2283_s8 + $0x78] sm:$0xff]  ;;  %v551_v52 = vld [vmem:[#allocation7 + $0x40] sm:$0xff]  ;;  %s2029_s8 = smov [#allocation10]  }
  0x93   : > { %v552_v53 = vld [vmem:[#allocation7 + $0x48] sm:$0xff]  ;;  %v553_v55 = vld [vmem:[#allocation7 + $0x50] sm:$0xff]  ;;  %v554_v56 = vld [vmem:[#allocation7 + $0x58] sm:$0xff]  ;;  %s1951_s30 = sshll.u32 %s2029_s8, 4  ;;  %s1952_s30 = int_to_ptr.vmem [resolvable:$false] %s1951_s30 }
  0x94   : > { %v1560_v54 = vpack.c.bf16 %v552_v53, %v551_v52  ;;  %v1564_v57 = vpack.c.bf16 %v554_v56, %v553_v55  ;;  %v555_v58 = vld [vmem:[#allocation7 + $0x60] sm:$0xff]  ;;  %v556_v59 = vld [vmem:[#allocation7 + $0x68] sm:$0xff]  ;;  %v557_v61 = vld [vmem:[#allocation7 + $0x70] sm:$0xff]  ;;  %s1953_s9 = scalar_lea.vmem %s1952_s30, 4096  ;;  %p1954_p12 = scmp.lt.s32.totalorder %s2695_s21, %s1952_s30 }
  0x95   : > { %1527 = vmatpush3.bf16.msra.mxu0 %v1524_v12  ;;  %1555 = vmatpush3.bf16.msra.mxu1 %v1552_v26  ;;  %v1568_v60 = vpack.c.bf16 %v556_v59, %v555_v58  ;;  %v558_v62 = vld [vmem:[#allocation7 + $0x78] sm:$0xff]  ;;  %v727_v0 = vld [vmem:[#allocation8] sm:$0xff]  ;;  %v728_v1 = vld [vmem:[#allocation8 + $0x8] sm:$0xff]  ;;  %p1955_p1 = scmp.lt.s32.totalorder %s1953_s9, %s1947_s11 }
  0x96   : > { %1529 = vmatprep.subr.bf16.mxu0 %v1528_v21  ;;  %1557 = vmatprep.subr.bf16.mxu1 %v1556_v32  ;;  %v1572_v63 = vpack.c.bf16 %v558_v62, %v557_v61  ;;  %v729_v2 = vld [vmem:[#allocation8 + $0x10] sm:$0xff]  ;;  %v1576_v3 = vpack.c.bf16 %v728_v1, %v727_v0  ;;  %v730_v4 = vld [vmem:[#allocation8 + $0x18] sm:$0xff]  ;;  %v731_v6 = vld [vmem:[#allocation8 + $0x20] sm:$0xff] }
  0x97   : > { %v2313_v5 = vpack.c.bf16 %v730_v4, %v729_v2  ;;  %v732_v7 = vld [vmem:[#allocation8 + $0x28] sm:$0xff]  ;;  %v733_v9 = vld [vmem:[#allocation8 + $0x30] sm:$0xff]  ;;  %v734_v10 = vld [vmem:[#allocation8 + $0x38] sm:$0xff]  ;;  %p1956_p2 = por %p1955_p1, %p1954_p12 }
  0x98   : > { %v2316_v8 = vpack.c.bf16 %v732_v7, %v731_v6  ;;  %v2320_v11 = vpack.c.bf16 %v734_v10, %v733_v9  ;;  %v735_v12 = vld [vmem:[#allocation8 + $0x40] sm:$0xff]  ;;  %v736_v13 = vld [vmem:[#allocation8 + $0x48] sm:$0xff]  ;;  %v737_v0 = vld [vmem:[#allocation8 + $0x50] sm:$0xff] }
  0x99   : > { %1531 = vmatpush3.bf16.msra.mxu0 %v1528_v21  ;;  %1559 = vmatpush3.bf16.msra.mxu1 %v1556_v32  ;;  %v2324_v14 = vpack.c.bf16 %v736_v13, %v735_v12  ;;  %v2332_v15 = vld [vmem:[%s2749_s2] ss:$0 sm:$0xff]  ;;  %v738_v1 = vld [vmem:[#allocation8 + $0x58] sm:$0xff]  ;;  %v740_v4 = vld [vmem:[#allocation8 + $0x68] sm:$0xff]  ;;  %p1957_p4 = pnand %p1956_p2, %p1950_p7 }
  0x9a   : > { %1533 = vmatprep.subr.bf16.mxu0 %v1532_v27  ;;  %1561 = vmatprep.subr.bf16.mxu1 %v1560_v54  ;;  %v1596_v2 = vpack.c.bf16 %v738_v1, %v737_v0  ;;  %v741_v6 = vld [vmem:[#allocation8 + $0x70] sm:$0xff]  ;;  %v742_v7 = vld [vmem:[#allocation8 + $0x78] sm:$0xff]  ;;  %v2361_v9 = vld [vmem:[%s2751_s4] ss:$0 sm:$0xff] }
  0x9d   : > { %1535 = vmatpush3.bf16.msra.mxu0 %v1532_v27  ;;  %1563 = vmatpush3.bf16.msra.mxu1 %v1560_v54 }
  0x9e   : > { %1537 = vmatprep.subr.bf16.mxu0 %v1536_v33  ;;  %1565 = vmatprep.subr.bf16.mxu1 %v1564_v57 }
  0xa1   : > { %1539 = vmatpush3.bf16.msra.mxu0 %v1536_v33  ;;  %1567 = vmatpush3.bf16.msra.mxu1 %v1564_v57 }
  0xa2   : > { %1541 = vmatprep.subr.bf16.mxu0 %v1540_v36  ;;  %1569 = vmatprep.subr.bf16.mxu1 %v1568_v60 }
  0xa5   : > { %1543 = vmatpush3.bf16.msra.mxu0 %v1540_v36  ;;  %1571 = vmatpush3.bf16.msra.mxu1 %v1568_v60 }
  0xa6   : > { %1573 = vmatprep.subr.bf16.mxu1 %v1572_v63  ;;  %1577 = vmatprep.subr.bf16.mxu0 %v1576_v3 }
  0xa8   : > { %1377 = vmatmul.mubr.f32.vlgmr.msra.gmra.mrb[0].mxu0 %v344_v37 }
  0xa9   : > { %1379 = vmatprep.mubr.f32.mxu0 %v345_v38  ;;  %1575 = vmatpush3.bf16.msra.mxu1 %v1572_v63 }
  0xaa   : > { %1608 = vmatprep.subr.bf16.mxu1 %v1576_v3  ;;  %1579 = vmatpush3.bf16.msra.mxu0 %v1576_v3 }
  0xab   : > { %1581 = vmatprep.subr.bf16.mxu0 %v2313_v5 }
  0xac   : > { %1380 = vmatmul.mubr.f32.gmra.mrb[2].mxu0 %v346_v39 }
  0xad   : > { %1382 = vmatprep.mubr.f32.mxu0 %v347_v40 }
  0xae   : > { %1583 = vmatpush3.bf16.msra.mxu0 %v2313_v5 }
  0xaf   : > { %1585 = vmatprep.subr.bf16.mxu0 %v2316_v8 }
  0xb0   : > { %1383 = vmatmul.mubr.f32.gmra.mrb[4].mxu0 %v348_v41 }
  0xb1   : > { %1385 = vmatprep.mubr.f32.mxu0 %v349_v42 }
  0xb2   : > { %1587 = vmatpush3.bf16.msra.mxu0 %v2316_v8 }
  0xb3   : > { %1589 = vmatprep.subr.bf16.mxu0 %v2320_v11 }
  0xb4   : > { %1386 = vmatmul.mubr.f32.gmra.mrb[6].mxu0 %v350_v43 }
  0xb5   : > { %1388 = vmatprep.mubr.f32.mxu0 %v351_v44 }
  0xb6   : > { %1591 = vmatpush3.bf16.msra.mxu0 %v2320_v11 }
  0xb7   : > { %1593 = vmatprep.subr.bf16.mxu0 %v2324_v14 }
  0xb8   : > { %1389 = vmatmul.mubr.f32.gmra.mrb[8].mxu0 %v352_v45 }
  0xb9   : > { %1391 = vmatprep.mubr.f32.mxu0 %v353_v46 }
  0xba   : > { %1595 = vmatpush3.bf16.msra.mxu0 %v2324_v14 }
  0xbb   : > { %1597 = vmatprep.subr.bf16.mxu0 %v1596_v2 }
  0xbc   : > { %1392 = vmatmul.mubr.f32.gmra.mrb[10].mxu0 %v354_v47 }
  0xbd   : > { %1394 = vmatprep.mubr.f32.mxu0 %v355_v48 }
  0xbe   : > { %1599 = vmatpush3.bf16.msra.mxu0 %v1596_v2 }
  0xc0   : > { %1395 = vmatmul.mubr.f32.gmra.mrb[12].mxu0 %v356_v49 }
  0xc1   : > { %1397 = vmatprep.mubr.f32.mxu0 %v357_v50 }
  0xc4   : > { %1398 = vmatmul.mubr.f32.gmra.mrb[14].mxu0 %v358_v51 }
 0x17b   : > { %v1378_v16 = vpop.f32.mrb[0].mxu0 }
 0x17c   : > { %v454_v17 = vadd.f32 %v1378_v16, %v2332_v15  ;;  %v448_v18 = vpop.f32.mrb[1].mxu0 }
 0x17d   : > { %v449_v19 = vadd.f32 %v2332_v15, %v448_v18 }
 0x17f   : > { %1705 = vtanh.f32 %v449_v19  ;;  %v1381_v20 = vpop.f32.mrb[2].mxu0 }
 0x180   : > { %1707 = vtanh.f32 %v454_v17  ;;  %v464_v21 = vadd.f32 %v1381_v20, %v2332_v15  ;;  %v458_v22 = vpop.f32.mrb[3].mxu0 }
 0x181   : > { %v459_v23 = vadd.f32 %v2332_v15, %v458_v22 }
 0x183   : > { %1709 = vtanh.f32 %v459_v23  ;;  %v1384_v24 = vpop.f32.mrb[4].mxu0 }
 0x184   : > { %1711 = vtanh.f32 %v464_v21  ;;  %v474_v25 = vadd.f32 %v1384_v24, %v2332_v15  ;;  %v468_v26 = vpop.f32.mrb[5].mxu0 }
 0x185   : > { %v469_v27 = vadd.f32 %v2332_v15, %v468_v26 }
 0x186   : > { %1713 = vtanh.f32 %v474_v25 }
 0x187   : > { %1715 = vtanh.f32 %v469_v27  ;;  %v1387_v28 = vpop.f32.mrb[6].mxu0 }
 0x188   : > { %v484_v29 = vadd.f32 %v1387_v28, %v2332_v15  ;;  %v478_v30 = vpop.f32.mrb[7].mxu0 }
 0x189   : > { %v1706_v31 = vpop.eup %1705  ;;  %v479_v32 = vadd.f32 %v2332_v15, %v478_v30 }
 0x18a   : > { %v1708_v33 = vpop.eup %1707  ;;  %1717 = vtanh.f32 %v484_v29  ;;  %1432 = vmatprep.mubr.f32.mxu1 %v1706_v31 }
 0x18b   : > { %1719 = vtanh.f32 %v479_v32  ;;  %v1390_v34 = vpop.f32.mrb[8].mxu0  ;;  %1433 = vmatmul.mubr.f32.vlgmr.msra.gmra.mrb[0].mxu1 %v1708_v33 }
 0x18c   : > { %v494_v35 = vadd.f32 %v1390_v34, %v2332_v15  ;;  %v488_v36 = vpop.f32.mrb[9].mxu0  ;;  %1616 = vmatpush3.bf16.msra.mxu1 %v1576_v3  ;;  %v739_v3 = vld [vmem:[#allocation8 + $0x60] sm:$0xff] }
 0x18d   : > { %v1710_v37 = vpop.eup %1709  ;;  %v489_v38 = vadd.f32 %v2332_v15, %v488_v36  ;;  %1609 = vmatprep.subr.bf16.mxu1 %v2313_v5 }
 0x18e   : > { %v1712_v39 = vpop.eup %1711  ;;  %1721 = vtanh.f32 %v494_v35  ;;  %1435 = vmatprep.mubr.f32.mxu1 %v1710_v37 }
 0x18f   : > { %1723 = vtanh.f32 %v489_v38  ;;  %v1393_v40 = vpop.f32.mrb[10].mxu0  ;;  %1436 = vmatmul.mubr.f32.gmra.mrb[2].mxu1 %v1712_v39 }
 0x190   : > { %v1714_v41 = vpop.eup %1713  ;;  %v504_v42 = vadd.f32 %v1393_v40, %v2332_v15  ;;  %v498_v43 = vpop.f32.mrb[11].mxu0  ;;  %1617 = vmatpush3.bf16.msra.mxu1 %v2313_v5  ;;  %v1600_v5 = vpack.c.bf16 %v740_v4, %v739_v3 }
 0x191   : > { %v1716_v44 = vpop.eup %1715  ;;  %v499_v45 = vadd.f32 %v2332_v15, %v498_v43  ;;  %1610 = vmatprep.subr.bf16.mxu1 %v2316_v8 }
 0x192   : > { %1725 = vtanh.f32 %v504_v42  ;;  %1438 = vmatprep.mubr.f32.mxu1 %v1716_v44  ;;  %1601 = vmatprep.subr.bf16.mxu0 %v1600_v5 }
 0x193   : > { %1727 = vtanh.f32 %v499_v45  ;;  %v1396_v46 = vpop.f32.mrb[12].mxu0  ;;  %1439 = vmatmul.mubr.f32.gmra.mrb[4].mxu1 %v1714_v41  ;;  %1603 = vmatpush3.bf16.msra.mxu0 %v1600_v5 }
 0x194   : > { %v1718_v47 = vpop.eup %1717  ;;  %v514_v48 = vadd.f32 %v1396_v46, %v2332_v15  ;;  %v508_v49 = vpop.f32.mrb[13].mxu0  ;;  %1618 = vmatpush3.bf16.msra.mxu1 %v2316_v8  ;;  %v1604_v8 = vpack.c.bf16 %v742_v7, %v741_v6 }
 0x195   : > { %v1720_v50 = vpop.eup %1719  ;;  %v509_v51 = vadd.f32 %v2332_v15, %v508_v49  ;;  %1611 = vmatprep.subr.bf16.mxu1 %v2320_v11 }
 0x196   : > { %1729 = vtanh.f32 %v514_v48  ;;  %1441 = vmatprep.mubr.f32.mxu1 %v1720_v50  ;;  %1605 = vmatprep.subr.bf16.mxu0 %v1604_v8 }
 0x197   : > { %1731 = vtanh.f32 %v509_v51  ;;  %v1399_v52 = vpop.f32.mrb[14].mxu0  ;;  %1442 = vmatmul.mubr.f32.gmra.mrb[6].mxu1 %v1718_v47  ;;  %1607 = vmatpush3.bf16.msra.mxu0 %v1604_v8 }
 0x198   : > { %v1722_v53 = vpop.eup %1721  ;;  %v524_v54 = vadd.f32 %v1399_v52, %v2332_v15  ;;  %v518_v55 = vpop.f32.mrb[15].mxu0  ;;  %1619 = vmatpush3.bf16.msra.mxu1 %v2320_v11 }
 0x199   : > { %v1724_v56 = vpop.eup %1723  ;;  %v519_v57 = vadd.f32 %v2332_v15, %v518_v55  ;;  %1612 = vmatprep.subr.bf16.mxu1 %v2324_v14 }
 0x19a   : > { %1733 = vtanh.f32 %v524_v54  ;;  %1444 = vmatprep.mubr.f32.mxu1 %v1724_v56 }
 0x19b   : > { %1735 = vtanh.f32 %v519_v57  ;;  %1445 = vmatmul.mubr.f32.gmra.mrb[8].mxu1 %v1722_v53 }
 0x19c   : > { %v1726_v58 = vpop.eup %1725  ;;  %1620 = vmatpush3.bf16.msra.mxu1 %v2324_v14 }
 0x19d   : > { %v1728_v59 = vpop.eup %1727  ;;  %1613 = vmatprep.subr.bf16.mxu1 %v1596_v2 }
 0x19e   : > { %1447 = vmatprep.mubr.f32.mxu1 %v1728_v59 }
 0x19f   : > { %1448 = vmatmul.mubr.f32.gmra.mrb[10].mxu1 %v1726_v58  ;;  %v895_v58 = vlaneseq }
 0x1a0   : > { %v1730_v60 = vpop.eup %1729  ;;  %1621 = vmatpush3.bf16.msra.mxu1 %v1596_v2 }
 0x1a1   : > { %v1732_v61 = vpop.eup %1731  ;;  %1614 = vmatprep.subr.bf16.mxu1 %v1600_v5  ;;  %v2379_v59 = vand.u32 127, %v895_v58 }
 0x1a2   : > { %1450 = vmatprep.mubr.f32.mxu1 %v1732_v61 }
 0x1a3   : > { %1451 = vmatmul.mubr.f32.gmra.mrb[12].mxu1 %v1730_v60  ;;  %v2384_v60 = vld [vmem:[%s2753_s6] ss:$0 sm:$0xff]  ;;  %vm897_vm0 = vcmp.lt.s32.totalorder %v2379_v59, 8  ;;  %vm898_vm1 = vcmp.eq.s32.totalorder %v2379_v59, 8 }
 0x1a4   : > { %v1734_v62 = vpop.eup %1733  ;;  %1622 = vmatpush3.bf16.msra.mxu1 %v1600_v5 }
 0x1a5   : > { %v1736_v63 = vpop.eup %1735  ;;  %1615 = vmatprep.subr.bf16.mxu1 %v1604_v8 }
 0x1a6   : > { %1453 = vmatprep.mubr.f32.mxu1 %v1736_v63 }
 0x1a7   : > { %1454 = vmatmul.mubr.f32.gmra.mrb[14].mxu1 %v1734_v62 }
 0x1a8   : > { %1623 = vmatpush3.bf16.msra.mxu1 %v1604_v8 }
 0x25e   : > { %v1434_v10 = vpop.f32.mrb[0].mxu1 }
 0x25f   : > { %v638_v11 = vadd.f32 %v1434_v10, %v2361_v9  ;;  %v632_v12 = vpop.f32.mrb[1].mxu1 }
 0x260   : > { %v633_v13 = vadd.f32 %v2361_v9, %v632_v12 }
 0x262   : > { %1737 = vtanh.f32 %v633_v13  ;;  %v1437_v14 = vpop.f32.mrb[2].mxu1 }
 0x263   : > { %1739 = vtanh.f32 %v638_v11  ;;  %v648_v15 = vadd.f32 %v1437_v14, %v2361_v9  ;;  %v642_v16 = vpop.f32.mrb[3].mxu1 }
 0x264   : > { %v643_v17 = vadd.f32 %v2361_v9, %v642_v16 }
 0x266   : > { %1741 = vtanh.f32 %v643_v17  ;;  %v1440_v18 = vpop.f32.mrb[4].mxu1 }
 0x267   : > { %1743 = vtanh.f32 %v648_v15  ;;  %v658_v19 = vadd.f32 %v1440_v18, %v2361_v9  ;;  %v652_v20 = vpop.f32.mrb[5].mxu1 }
 0x268   : > { %v653_v21 = vadd.f32 %v2361_v9, %v652_v20 }
 0x269   : > { %1745 = vtanh.f32 %v658_v19 }
 0x26a   : > { %1747 = vtanh.f32 %v653_v21  ;;  %v1443_v22 = vpop.f32.mrb[6].mxu1 }
 0x26b   : > { %v668_v23 = vadd.f32 %v1443_v22, %v2361_v9  ;;  %v662_v24 = vpop.f32.mrb[7].mxu1 }
 0x26c   : > { %v1738_v25 = vpop.eup %1737  ;;  %v663_v26 = vadd.f32 %v2361_v9, %v662_v24 }
 0x26d   : > { %v1740_v27 = vpop.eup %1739  ;;  %1749 = vtanh.f32 %v668_v23  ;;  %1488 = vmatprep.mubr.f32.mxu0 %v1738_v25 }
 0x26e   : > { %1751 = vtanh.f32 %v663_v26  ;;  %v1446_v28 = vpop.f32.mrb[8].mxu1  ;;  %1489 = vmatmul.mubr.f32.vlgmr.msra.gmra.mrb[16].mxu0 %v1740_v27 }
 0x26f   : > { %v678_v29 = vadd.f32 %v1446_v28, %v2361_v9  ;;  %v672_v30 = vpop.f32.mrb[9].mxu1 }
 0x270   : > { %v1742_v31 = vpop.eup %1741  ;;  %v673_v32 = vadd.f32 %v2361_v9, %v672_v30 }
 0x271   : > { %v1744_v33 = vpop.eup %1743  ;;  %1753 = vtanh.f32 %v678_v29  ;;  %1491 = vmatprep.mubr.f32.mxu0 %v1742_v31 }
 0x272   : > { %1755 = vtanh.f32 %v673_v32  ;;  %v1449_v34 = vpop.f32.mrb[10].mxu1  ;;  %1492 = vmatmul.mubr.f32.gmra.mrb[18].mxu0 %v1744_v33 }
 0x273   : > { %v1746_v35 = vpop.eup %1745  ;;  %v688_v36 = vadd.f32 %v1449_v34, %v2361_v9  ;;  %v682_v37 = vpop.f32.mrb[11].mxu1 }
 0x274   : > { %v1748_v38 = vpop.eup %1747  ;;  %v683_v39 = vadd.f32 %v2361_v9, %v682_v37 }
 0x275   : > { %1757 = vtanh.f32 %v688_v36  ;;  %1494 = vmatprep.mubr.f32.mxu0 %v1748_v38 }
 0x276   : > { %1759 = vtanh.f32 %v683_v39  ;;  %v1452_v40 = vpop.f32.mrb[12].mxu1  ;;  %1495 = vmatmul.mubr.f32.gmra.mrb[20].mxu0 %v1746_v35 }
 0x277   : > { %v1750_v41 = vpop.eup %1749  ;;  %v698_v42 = vadd.f32 %v1452_v40, %v2361_v9  ;;  %v692_v43 = vpop.f32.mrb[13].mxu1 }
 0x278   : > { %v1752_v44 = vpop.eup %1751  ;;  %v693_v45 = vadd.f32 %v2361_v9, %v692_v43 }
 0x279   : > { %1761 = vtanh.f32 %v698_v42  ;;  %1497 = vmatprep.mubr.f32.mxu0 %v1752_v44 }
 0x27a   : > { %1763 = vtanh.f32 %v693_v45  ;;  %v1455_v46 = vpop.f32.mrb[14].mxu1  ;;  %1498 = vmatmul.mubr.f32.gmra.mrb[22].mxu0 %v1750_v41 }
 0x27b   : > { %v1754_v47 = vpop.eup %1753  ;;  %v708_v48 = vadd.f32 %v1455_v46, %v2361_v9  ;;  %v702_v49 = vpop.f32.mrb[15].mxu1 }
 0x27c   : > { %v1756_v50 = vpop.eup %1755  ;;  %v703_v51 = vadd.f32 %v2361_v9, %v702_v49 }
 0x27d   : > { %1765 = vtanh.f32 %v708_v48  ;;  %1500 = vmatprep.mubr.f32.mxu1 %v1756_v50 }
 0x27e   : > { %1767 = vtanh.f32 %v703_v51  ;;  %1501 = vmatmul.mubr.f32.vlgmr.msra.gmra.mrb[16].mxu1 %v1754_v47 }
 0x27f   : > { %v1758_v52 = vpop.eup %1757 }
 0x280   : > { %v1760_v53 = vpop.eup %1759 }
 0x281   : > { %1503 = vmatprep.mubr.f32.mxu1 %v1760_v53 }
 0x282   : > { %1504 = vmatmul.mubr.f32.gmra.mrb[18].mxu1 %v1758_v52 }
 0x283   : > { %v1762_v54 = vpop.eup %1761 }
 0x284   : > { %v1764_v55 = vpop.eup %1763 }
 0x285   : > { %1506 = vmatprep.mubr.f32.mxu1 %v1764_v55 }
 0x286   : > { %1507 = vmatmul.mubr.f32.gmra.mrb[20].mxu1 %v1762_v54 }
 0x287   : > { %v1766_v56 = vpop.eup %1765 }
 0x288   : > { %v1768_v57 = vpop.eup %1767 }
 0x289   : > { %1509 = vmatprep.mubr.f32.mxu1 %v1768_v57 }
 0x28a   : > { %1510 = vmatmul.mubr.f32.gmra.mrb[22].mxu1 %v1766_v56 }
 0x341   : > { %v1490_v61 = vpop.f32.mrb[16].mxu0 }
 0x342   : > { %v822_v62 = vadd.f32 %v1490_v61, %v2384_v60  ;;  %v816_v63 = vpop.f32.mrb[17].mxu0 }
 0x343   : > { %v817_v0 = vadd.f32 %v2384_v60, %v816_v63 }
 0x344   : > { %v2392_v1 = vsel %vm898_vm1, %v822_v62, 0.0  ;;  %v2396_v2 = vsel %vm897_vm0, %v822_v62, -inf }
 0x345   : > { %v2400_v3 = vsel %vm898_vm1, %v817_v0, 0.0  ;;  %917 = vmax.xlane.f32.xlu0 %v2396_v2  ;;  %v1493_v4 = vpop.f32.mrb[18].mxu0  ;;  %v2415_v10 = vsel %vm897_vm0, %v817_v0, -inf }
 0x346   : > { %v832_v5 = vadd.f32 %v1493_v4, %v2384_v60  ;;  %v826_v6 = vpop.f32.mrb[19].mxu0 }
 0x347   : > { %v827_v7 = vadd.f32 %v2384_v60, %v826_v6 }
 0x348   : > { %v2407_v8 = vsel %vm898_vm1, %v832_v5, 0.0  ;;  %v2411_v9 = vsel %vm897_vm0, %v832_v5, -inf }
 0x349   : > { %v2419_v11 = vsel %vm898_vm1, %v827_v7, 0.0  ;;  %921 = vmax.xlane.f32.xlu1 %v2411_v9  ;;  %v1496_v12 = vpop.f32.mrb[20].mxu0  ;;  %915 = vmax.xlane.f32.xlu0 %v2415_v10  ;;  %v2431_v17 = vsel %vm897_vm0, %v827_v7, -inf }
 0x34a   : > { %v842_v13 = vadd.f32 %v1496_v12, %v2384_v60  ;;  %v836_v14 = vpop.f32.mrb[21].mxu0 }
 0x34b   : > { %v837_v15 = vadd.f32 %v2384_v60, %v836_v14 }
 0x34c   : > { %v2427_v16 = vsel %vm898_vm1, %v842_v13, 0.0  ;;  %v2451_v25 = vsel %vm897_vm0, %v842_v13, -inf }
 0x34d   : > { %v2435_v18 = vsel %vm898_vm1, %v837_v15, 0.0  ;;  %v1499_v19 = vpop.f32.mrb[22].mxu0  ;;  %919 = vmax.xlane.f32.xlu1 %v2431_v17  ;;  %v2440_v20 = vsel %vm897_vm0, %v837_v15, -inf }
 0x34e   : > { %v852_v21 = vadd.f32 %v1499_v19, %v2384_v60  ;;  %v846_v22 = vpop.f32.mrb[23].mxu0  ;;  %923 = vmax.xlane.f32.xlu0 %v2440_v20 }
 0x34f   : > { %v847_v23 = vadd.f32 %v2384_v60, %v846_v22 }
 0x350   : > { %v2447_v24 = vsel %vm898_vm1, %v852_v21, 0.0  ;;  %v2471_v33 = vsel %vm897_vm0, %v852_v21, -inf }
 0x351   : > { %v2455_v26 = vsel %vm898_vm1, %v847_v23, 0.0  ;;  %v1502_v27 = vpop.f32.mrb[16].mxu1  ;;  %925 = vmax.xlane.f32.xlu1 %v2451_v25  ;;  %v2460_v28 = vsel %vm897_vm0, %v847_v23, -inf }
 0x352   : > { %v862_v29 = vadd.f32 %v1502_v27, %v2384_v60  ;;  %v856_v30 = vpop.f32.mrb[17].mxu1  ;;  %927 = vmax.xlane.f32.xlu0 %v2460_v28 }
 0x353   : > { %v857_v31 = vadd.f32 %v2384_v60, %v856_v30 }
 0x354   : > { %v2467_v32 = vsel %vm898_vm1, %v862_v29, 0.0  ;;  %v2491_v41 = vsel %vm897_vm0, %v862_v29, -inf }
 0x355   : > { %v2475_v34 = vsel %vm898_vm1, %v857_v31, 0.0  ;;  %v1505_v35 = vpop.f32.mrb[18].mxu1  ;;  %929 = vmax.xlane.f32.xlu1 %v2471_v33  ;;  %v2480_v36 = vsel %vm897_vm0, %v857_v31, -inf }
 0x356   : > { %v872_v37 = vadd.f32 %v1505_v35, %v2384_v60  ;;  %v866_v38 = vpop.f32.mrb[19].mxu1  ;;  %931 = vmax.xlane.f32.xlu0 %v2480_v36 }
 0x357   : > { %v867_v39 = vadd.f32 %v2384_v60, %v866_v38 }
 0x358   : > { %v2487_v40 = vsel %vm898_vm1, %v872_v37, 0.0  ;;  %v2511_v49 = vsel %vm897_vm0, %v872_v37, -inf }
 0x359   : > { %v2495_v42 = vsel %vm898_vm1, %v867_v39, 0.0  ;;  %v1508_v43 = vpop.f32.mrb[20].mxu1  ;;  %933 = vmax.xlane.f32.xlu1 %v2491_v41  ;;  %v2500_v44 = vsel %vm897_vm0, %v867_v39, -inf }
 0x35a   : > { %v882_v45 = vadd.f32 %v1508_v43, %v2384_v60  ;;  %v876_v46 = vpop.f32.mrb[21].mxu1  ;;  %935 = vmax.xlane.f32.xlu0 %v2500_v44 }
 0x35b   : > { %v877_v47 = vadd.f32 %v2384_v60, %v876_v46 }
 0x35c   : > { %v2507_v48 = vsel %vm898_vm1, %v882_v45, 0.0  ;;  %v2531_v57 = vsel %vm897_vm0, %v882_v45, -inf }
 0x35d   : > { %v2515_v50 = vsel %vm898_vm1, %v877_v47, 0.0  ;;  %v1511_v51 = vpop.f32.mrb[22].mxu1  ;;  %937 = vmax.xlane.f32.xlu1 %v2511_v49  ;;  %v2520_v52 = vsel %vm897_vm0, %v877_v47, -inf }
 0x35e   : > { %v892_v53 = vadd.f32 %v1511_v51, %v2384_v60  ;;  %v886_v54 = vpop.f32.mrb[23].mxu1  ;;  %939 = vmax.xlane.f32.xlu0 %v2520_v52 }
 0x35f   : > { %v887_v55 = vadd.f32 %v2384_v60, %v886_v54 }
 0x360   : > { %v2527_v56 = vsel %vm898_vm1, %v892_v53, 0.0  ;;  %v2545_v60 = vsel %vm897_vm0, %v892_v53, -inf }
 0x361   : > { %v2535_v58 = vsel %vm898_vm1, %v887_v55, 0.0  ;;  %941 = vmax.xlane.f32.xlu1 %v2531_v57  ;;  %v2540_v61 = vsel %vm897_vm0, %v887_v55, -inf }
 0x362   : > { %943 = vmax.xlane.f32.xlu0 %v2540_v61 }
 0x365   : > { %945 = vmax.xlane.f32.xlu1 %v2545_v60 }
 0x3d2   : > { %v918_v62 = vpop.xlane.xlu0 %917 }
 0x3d3   : > { %v948_v63 = vsub.f32 %v2396_v2, %v918_v62 }
 0x3d5   : > { %v965_v0 = vmul.f32 1.442695, %v948_v63 }
 0x3d6   : > { %v922_v4 = vpop.xlane.xlu1 %921  ;;  %v916_v5 = vpop.xlane.xlu0 %915 }
 0x3d7   : > { %1769 = vpow2.f32 %v965_v0  ;;  %v950_v6 = vsub.f32 %v2411_v9, %v922_v4  ;;  %v947_v7 = vsub.f32 %v2415_v10, %v916_v5 }
 0x3d9   : > { %v969_v12 = vmul.f32 1.442695, %v950_v6  ;;  %v963_v13 = vmul.f32 1.442695, %v947_v7 }
 0x3da   : > { %v920_v14 = vpop.xlane.xlu1 %919 }
 0x3db   : > { %1771 = vpow2.f32 %v969_v12  ;;  %v949_v15 = vsub.f32 %v2431_v17, %v920_v14  ;;  %v924_v19 = vpop.xlane.xlu0 %923 }
 0x3dc   : > { %1773 = vpow2.f32 %v963_v13  ;;  %v951_v21 = vsub.f32 %v2440_v20, %v924_v19 }
 0x3dd   : > { %v967_v22 = vmul.f32 1.442695, %v949_v15 }
 0x3de   : > { %v926_v2 = vpop.xlane.xlu1 %925  ;;  %v971_v29 = vmul.f32 1.442695, %v951_v21 }
 0x3df   : > { %1775 = vpow2.f32 %v967_v22  ;;  %v952_v23 = vsub.f32 %v2451_v25, %v926_v2  ;;  %v928_v27 = vpop.xlane.xlu0 %927 }
 0x3e0   : > { %v953_v9 = vsub.f32 %v2460_v28, %v928_v27 }
 0x3e1   : > { %v2555_v10 = vpop.eup %1769  ;;  %v973_v30 = vmul.f32 1.442695, %v952_v23 }
 0x3e2   : > { %997 = vadd.xlane.f32.xlu1 %v2555_v10  ;;  %v930_v31 = vpop.xlane.xlu1 %929  ;;  %v975_v20 = vmul.f32 1.442695, %v953_v9 }
 0x3e3   : > { %1777 = vpow2.f32 %v973_v30  ;;  %v954_v17 = vsub.f32 %v2471_v33, %v930_v31  ;;  %v932_v35 = vpop.xlane.xlu0 %931 }
 0x3e4   : > { %1779 = vpow2.f32 %v971_v29  ;;  %v955_v37 = vsub.f32 %v2480_v36, %v932_v35 }
 0x3e5   : > { %v2560_v38 = vpop.eup %1771  ;;  %v977_v25 = vmul.f32 1.442695, %v954_v17 }
 0x3e6   : > { %v2562_v39 = vpop.eup %1773  ;;  %1001 = vadd.xlane.f32.xlu1 %v2560_v38  ;;  %v934_v28 = vpop.xlane.xlu1 %933  ;;  %v979_v33 = vmul.f32 1.442695, %v955_v37 }
 0x3e7   : > { %1781 = vpow2.f32 %v977_v25  ;;  %v956_v43 = vsub.f32 %v2491_v41, %v934_v28  ;;  %995 = vadd.xlane.f32.xlu0 %v2562_v39  ;;  %v936_v45 = vpop.xlane.xlu0 %935 }
 0x3e8   : > { %1783 = vpow2.f32 %v975_v20  ;;  %v957_v46 = vsub.f32 %v2500_v44, %v936_v45 }
 0x3e9   : > { %v2568_v47 = vpop.eup %1775  ;;  %v981_v36 = vmul.f32 1.442695, %v956_v43 }
 0x3ea   : > { %v938_v51 = vpop.xlane.xlu1 %937  ;;  %v983_v55 = vmul.f32 1.442695, %v957_v46 }
 0x3eb   : > { %1785 = vpow2.f32 %v981_v36  ;;  %v958_v53 = vsub.f32 %v2511_v49, %v938_v51  ;;  %999 = vadd.xlane.f32.xlu0 %v2568_v47  ;;  %v940_v54 = vpop.xlane.xlu0 %939 }
 0x3ec   : > { %1787 = vpow2.f32 %v979_v33  ;;  %v959_v41 = vsub.f32 %v2520_v52, %v940_v54 }
 0x3ed   : > { %v2573_v62 = vpop.eup %1777  ;;  %v985_v63 = vmul.f32 1.442695, %v958_v53 }
 0x3ee   : > { %v2575_v0 = vpop.eup %1779  ;;  %1005 = vadd.xlane.f32.xlu1 %v2573_v62  ;;  %v942_v44 = vpop.xlane.xlu1 %941  ;;  %v987_v5 = vmul.f32 1.442695, %v959_v41 }
 0x3ef   : > { %1789 = vpow2.f32 %v985_v63  ;;  %v960_v4 = vsub.f32 %v2531_v57, %v942_v44  ;;  %1003 = vadd.xlane.f32.xlu0 %v2575_v0  ;;  %v944_v49 = vpop.xlane.xlu0 %943 }
 0x3f0   : > { %1791 = vpow2.f32 %v983_v55  ;;  %v961_v6 = vsub.f32 %v2540_v61, %v944_v49 }
 0x3f1   : > { %v2581_v7 = vpop.eup %1781  ;;  %v989_v52 = vmul.f32 1.442695, %v960_v4 }
 0x3f2   : > { %v2583_v12 = vpop.eup %1783  ;;  %1009 = vadd.xlane.f32.xlu1 %v2581_v7  ;;  %v946_v13 = vpop.xlane.xlu1 %945  ;;  %v991_v57 = vmul.f32 1.442695, %v961_v6 }
 0x3f3   : > { %1793 = vpow2.f32 %v989_v52  ;;  %v962_v14 = vsub.f32 %v2545_v60, %v946_v13  ;;  %1007 = vadd.xlane.f32.xlu0 %v2583_v12 }
 0x3f4   : > { %1795 = vpow2.f32 %v987_v5 }
 0x3f5   : > { %v2588_v15 = vpop.eup %1785  ;;  %v993_v19 = vmul.f32 1.442695, %v962_v14 }
 0x3f6   : > { %v2590_v21 = vpop.eup %1787  ;;  %1013 = vadd.xlane.f32.xlu1 %v2588_v15 }
 0x3f7   : > { %1797 = vpow2.f32 %v993_v19  ;;  %1011 = vadd.xlane.f32.xlu0 %v2590_v21 }
 0x3f8   : > { %1799 = vpow2.f32 %v991_v57 }
 0x3f9   : > { %v2594_v61 = vpop.eup %1789 }
 0x3fa   : > { %v2596_v22 = vpop.eup %1791  ;;  %1017 = vadd.xlane.f32.xlu1 %v2594_v61 }
 0x3fb   : > { %1015 = vadd.xlane.f32.xlu0 %v2596_v22 }
 0x3fd   : > { %v2600_v60 = vpop.eup %1793 }
 0x3fe   : > { %v2602_v2 = vpop.eup %1795  ;;  %1021 = vadd.xlane.f32.xlu1 %v2600_v60 }
 0x3ff   : > { %1019 = vadd.xlane.f32.xlu0 %v2602_v2 }
 0x401   : > { %v2606_v23 = vpop.eup %1797 }
 0x402   : > { %v2608_v27 = vpop.eup %1799  ;;  %1025 = vadd.xlane.f32.xlu1 %v2606_v23 }
 0x403   : > { %1023 = vadd.xlane.f32.xlu0 %v2608_v27 }
 0x46f   : > { %v998_v29 = vpop.xlane.xlu1 %997 }
 0x470   : > { %1801 = vrcp.f32 %v998_v29 }
 0x473   : > { %v1002_v9 = vpop.xlane.xlu1 %1001 }
 0x474   : > { %1803 = vrcp.f32 %v1002_v9  ;;  %v996_v30 = vpop.xlane.xlu0 %995 }
 0x475   : > { %1805 = vrcp.f32 %v996_v30 }
 0x478   : > { %v1000_v31 = vpop.xlane.xlu0 %999 }
 0x479   : > { %1807 = vrcp.f32 %v1000_v31 }
 0x47a   : > { %v1802_v17 = vpop.eup %1801 }
 0x47b   : > { %v1044_v35 = vmul.f32 %v1802_v17, %v2555_v10  ;;  %v1006_v20 = vpop.xlane.xlu1 %1005 }
 0x47c   : > { %1809 = vrcp.f32 %v1006_v20  ;;  %v1004_v37 = vpop.xlane.xlu0 %1003 }
 0x47d   : > { %v1076_v25 = vsel %vm897_vm0, %v1044_v35, %v2392_v1  ;;  %1811 = vrcp.f32 %v1004_v37 }
 0x47e   : > { %v1804_v28 = vpop.eup %1803  ;;  %1092 = vst [vmem:[%s2618_s12 + $0x8] sm:$0xff] %v1076_v25 }
 0x47f   : > { %v1806_v43 = vpop.eup %1805  ;;  %v1046_v45 = vmul.f32 %v1804_v28, %v2560_v38  ;;  %v1010_v10 = vpop.xlane.xlu1 %1009 }
 0x480   : > { %v1043_v33 = vmul.f32 %v1806_v43, %v2562_v39  ;;  %1813 = vrcp.f32 %v1010_v10  ;;  %v1008_v46 = vpop.xlane.xlu0 %1007 }
 0x481   : > { %v1078_v1 = vsel %vm897_vm0, %v1046_v45, %v2407_v8  ;;  %1815 = vrcp.f32 %v1008_v46 }
 0x482   : > { %1094 = vst [vmem:[%s2618_s12 + $0x18] sm:$0xff] %v1078_v1  ;;  %v1075_v36 = vsel %vm897_vm0, %v1043_v33, %v2400_v3 }
 0x483   : > { %v1808_v51 = vpop.eup %1807  ;;  %1091 = vst [vmem:[%s2618_s12] sm:$0xff] %v1075_v36  ;;  %v1014_v53 = vpop.xlane.xlu1 %1013 }
 0x484   : > { %v1045_v38 = vmul.f32 %v1808_v51, %v2568_v47  ;;  %1817 = vrcp.f32 %v1014_v53  ;;  %v1012_v39 = vpop.xlane.xlu0 %1011 }
 0x485   : > { %1819 = vrcp.f32 %v1012_v39 }
 0x486   : > { %v1810_v54 = vpop.eup %1809  ;;  %v1077_v8 = vsel %vm897_vm0, %v1045_v38, %v2419_v11 }
 0x487   : > { %v1812_v55 = vpop.eup %1811  ;;  %1093 = vst [vmem:[%s2618_s12 + $0x10] sm:$0xff] %v1077_v8  ;;  %v1048_v41 = vmul.f32 %v1810_v54, %v2573_v62  ;;  %v1018_v3 = vpop.xlane.xlu1 %1017 }
 0x488   : > { %v1047_v63 = vmul.f32 %v1812_v55, %v2575_v0  ;;  %1821 = vrcp.f32 %v1018_v3  ;;  %v1016_v44 = vpop.xlane.xlu0 %1015 }
 0x489   : > { %v1080_v47 = vsel %vm897_vm0, %v1048_v41, %v2427_v16  ;;  %1823 = vrcp.f32 %v1016_v44 }
 0x48a   : > { %v1814_v4 = vpop.eup %1813  ;;  %1096 = vst [vmem:[%s2618_s12 + $0x28] sm:$0xff] %v1080_v47  ;;  %v1079_v11 = vsel %vm897_vm0, %v1047_v63, %v2435_v18 }
 0x48b   : > { %v1816_v49 = vpop.eup %1815  ;;  %1095 = vst [vmem:[%s2618_s12 + $0x20] sm:$0xff] %v1079_v11  ;;  %v1050_v62 = vmul.f32 %v1814_v4, %v2581_v7  ;;  %v1022_v0 = vpop.xlane.xlu1 %1021 }
 0x48c   : > { %v1049_v5 = vmul.f32 %v1816_v49, %v2583_v12  ;;  %1825 = vrcp.f32 %v1022_v0  ;;  %v1020_v6 = vpop.xlane.xlu0 %1019 }
 0x48d   : > { %v1082_v16 = vsel %vm897_vm0, %v1050_v62, %v2447_v24  ;;  %1827 = vrcp.f32 %v1020_v6 }
 0x48e   : > { %v1818_v52 = vpop.eup %1817  ;;  %1098 = vst [vmem:[%s2618_s12 + $0x38] sm:$0xff] %v1082_v16  ;;  %v1081_v18 = vsel %vm897_vm0, %v1049_v5, %v2455_v26 }
 0x48f   : > { %v1820_v13 = vpop.eup %1819  ;;  %1097 = vst [vmem:[%s2618_s12 + $0x30] sm:$0xff] %v1081_v18  ;;  %v1052_v7 = vmul.f32 %v1818_v52, %v2588_v15  ;;  %v1026_v12 = vpop.xlane.xlu1 %1025 }
 0x490   : > { %v1051_v14 = vmul.f32 %v1820_v13, %v2590_v21  ;;  %1829 = vrcp.f32 %v1026_v12  ;;  %v1024_v57 = vpop.xlane.xlu0 %1023 }
 0x491   : > { %v1084_v24 = vsel %vm897_vm0, %v1052_v7, %v2467_v32  ;;  %1831 = vrcp.f32 %v1024_v57 }
 0x492   : > { %v1822_v19 = vpop.eup %1821  ;;  %1100 = vst [vmem:[%s2618_s12 + $0x48] sm:$0xff] %v1084_v24  ;;  %v1083_v26 = vsel %vm897_vm0, %v1051_v14, %v2475_v34 }
 0x493   : > { %v1824_v15 = vpop.eup %1823  ;;  %1099 = vst [vmem:[%s2618_s12 + $0x40] sm:$0xff] %v1083_v26  ;;  %v1054_v21 = vmul.f32 %v1822_v19, %v2594_v61 }
 0x494   : > { %v1053_v29 = vmul.f32 %v1824_v15, %v2596_v22 }
 0x495   : > { %v1086_v32 = vsel %vm897_vm0, %v1054_v21, %v2487_v40 }
 0x496   : > { %v1826_v9 = vpop.eup %1825  ;;  %1102 = vst [vmem:[%s2618_s12 + $0x58] sm:$0xff] %v1086_v32  ;;  %v1085_v30 = vsel %vm897_vm0, %v1053_v29, %v2495_v42 }
 0x497   : > { %v1828_v31 = vpop.eup %1827  ;;  %1101 = vst [vmem:[%s2618_s12 + $0x50] sm:$0xff] %v1085_v30  ;;  %v1056_v34 = vmul.f32 %v1826_v9, %v2600_v60 }
 0x498   : > { %v1055_v61 = vmul.f32 %v1828_v31, %v2602_v2 }
 0x499   : > { %v1088_v22 = vsel %vm897_vm0, %v1056_v34, %v2507_v48 }
 0x49a   : > { %v1830_v40 = vpop.eup %1829  ;;  %1104 = vst [vmem:[%s2618_s12 + $0x68] sm:$0xff] %v1088_v22  ;;  %v1087_v42 = vsel %vm897_vm0, %v1055_v61, %v2515_v50 }
 0x49b   : > { %v1832_v17 = vpop.eup %1831  ;;  %1103 = vst [vmem:[%s2618_s12 + $0x60] sm:$0xff] %v1087_v42  ;;  %v1058_v60 = vmul.f32 %v1830_v40, %v2606_v23 }
 0x49c   : > { %v1057_v2 = vmul.f32 %v1832_v17, %v2608_v27 }
 0x49d   : > { %v1090_v48 = vsel %vm897_vm0, %v1058_v60, %v2527_v56 }
 0x49e   : > { %1106 = vst [vmem:[%s2618_s12 + $0x78] sm:$0xff] %v1090_v48  ;;  %v1089_v50 = vsel %vm897_vm0, %v1057_v2, %v2535_v58 }
 0x49f   : > { %1105 = vst [vmem:[%s2618_s12 + $0x70] sm:$0xff] %v1089_v50 }
 0x4a0   : > { %1960 = shalt.err (!%p1957_p4)
}
 0x4a1   : > { %s1961_s13 = scalar_lea.hbm %s2693_s23, 2048  ;;  %s1965_s14 = scalar_lea.hbm %s2754_s7, 4096 }
 0x4a2   : > { %p1962_p9 = scmp.ne.s32.totalorder %s2693_s23, %s1961_s13  ;;  %p1966_p8 = scmp.lt.u32.totalorder %s2693_s23, %s2754_s7 }
 0x4a3   : > { %p1967_p13 = scmp.lt.u32.totalorder %s1965_s14, %s1961_s13  ;;  %p1969_p10 = scmp.lt.u32.totalorder %s1961_s13, %s2693_s23 }
 0x4a4   : > { %p1963_p0 = pnand %p1962_p9, %p2226_p5 }
 0x4a5   : > { %p1968_p6 = por %p1967_p13, %p1966_p8 }
 0x4a6   : > { %p1964_p11 = pneg %p1963_p0 }
 0x4a7   : > { %p1970_p3 = por %p1969_p10, %p1968_p6 }
 0x4a9   : > { %p1971_p7 = pnand %p1970_p3, %p1964_p11 }
 0x4ab   : > { %1974 = shalt.err (!%p1971_p7)
}
 0x4ac   : > { %s2030_s16 = smov 128   ;;  %s2031_s29 = smov 8  }
 0x4ad   : > { %1638 = dma.vmem_to_hbm [thread:$0]  (%p2226_p5), %s2695_s21, 2048, %s2693_s23, %s1108_s28, %s2030_s16, %s2030_s16, %s2031_s29  }
 0x4ae PF: > { %s2774_s11 = sld [smem:[#allocation15_spill]]  ;;  %s1136_s8 = sand.u32 1, %s2009_s24  }
 0x4af   : > { %p2776_p1 = scmp.ge.s32.totalorder %s2021_s27, 2  ;;  %s1137_s30 = scalar_lea.sflag [#allocation4], %s1136_s8 }
 0x4b4   : > { %p2775_p12 = scmp.ne.s32.totalorder %s2774_s11, 0 }
 0x4b6   : > { %p1655_p2 = pnand %p2776_p1, %p2775_p12 }
 0x4b8   : > { %2004 = dma.done.wait (!%p1655_p2), %s1137_s30, 2048  }
 0x4b9   : > { %2006 = vsyncadd (!%p1655_p2), %s1137_s30, 4294965248  ;;  %p22_p4 = scmp.ge.s32.totalorder %s2212_s22, 4   ;;  %s2777_s24 = smov %s2013_s25 }
 0x4ba   : > { %s2778_s25 = smov %s2017_s26  ;;  %s2779_s26 = smov %s2222_s18 }
 0x4bb   : > { %s2780_s27 = smov %s2212_s22  ;;  %24 = sbr.rel (!%p22_p4) target bundleno = 7 (0x7), region = 105 }
 0x4c2   :  { %1142 = vsyncpa [#allocation3], 1 }
 0x4c3   :  { %1144 = vsyncpa [#allocation3 + $0x1], 1 }
 0x4c4   :  { %1145 = vsyncpa [#allocation6], 1 }
 0x4c5   :  { %1146 = vsyncpa [#allocation9], 1 }
 0x4c6   :  { %1147 = vsyncpa [#allocation4], 1 }
 0x4c7   :  { %1149 = vsyncpa [#allocation4 + $0x1], 1 }

</bundles_post_ra>
